<compile_context>
chip_gen: v6e
topology: v6e:2x2x1
jax: 0.10.0
libtpu: 0.0.40
codegen_flags: <defaults>
</compile_context>

<pallas_src>
import functools

import jax
import jax.numpy as jnp
from jax.experimental import pallas as pl
from jax.experimental.pallas import tpu as pltpu


def _tpu_vmem_capacity_bytes():
    default = 64 * 1024 * 1024  # v7x per-core physical VMEM (smallest recent gen)
    try:
        info = pltpu.get_tpu_info()
    except Exception:
        return default
    cap = getattr(info, "vmem_capacity_bytes", None)
    return int(cap) if cap else default


def _per_lane_vmem_bytes(c, itemsize):
    # Per lane of a pixel tile:
    #   2 * C * itemsize   double-buffered logits block
    #   ~6 * C * 4         f32 intermediates (upcast, x-m, exp, one-hot selects, ...)
    #   2 * 4 + 4          double-buffered targets (int32 worst case) + f32 accumulator
    return c * (2 * itemsize + 6 * 4) + 2 * 4 + 4


def _choose_tile_hw(hw, c, itemsize):
    """Pick the pixel-tile width from a VMEM byte budget (not a fixed lane cap)."""
    vmem_cap = _tpu_vmem_capacity_bytes()
    budget = int(vmem_cap * 0.55)  # leave headroom for compiler scratch
    target = max(512, min(budget // _per_lane_vmem_bytes(c, itemsize), 256 * 1024))
    if hw <= target:
        return hw                               # full-extent block (always legal)
    return max(128, (target // 128) * 128)      # lane-aligned tile


def _vmem_limit_bytes(tile_hw, c, itemsize):
    cap = _tpu_vmem_capacity_bytes()
    est = tile_hw * _per_lane_vmem_bytes(c, itemsize) + (4 << 20)
    return int(min(0.75 * cap, max(est, 32 << 20)))


def _focal_loss_kernel(x_ref, t_ref, out_ref, *, gamma, hw, tile_hw,
                       tiles_per_group, full_tiles, needs_mask):
    g = pl.program_id(1)   # pixel-tile group (parallel; feeds the 2nd TC on v7x)
    ti = pl.program_id(2)  # tile within group (reduction axis)

    @pl.when(ti == 0)
    def _():
        out_ref[...] = jnp.zeros_like(out_ref)

    # (C, T) logits: channels on sublanes, pixels on lanes. Math in f32.
    x = x_ref[...].astype(jnp.float32)           # (C, T)
    tgt = t_ref[...].astype(jnp.int32)           # (1, T) class ids (cheap in-VMEM cast)
    c = x.shape[0]

    # One-hot of the target class: (C, 1) iota broadcast against (1, T) targets.
    cls = jax.lax.broadcasted_iota(jnp.int32, (c, 1), 0)
    onehot = cls == tgt                          # (C, T) bool via broadcast

    # Numerically stable softmax pieces over the channel (sublane) axis.
    m = jnp.max(x, axis=0, keepdims=True)                            # (1, T)
    e = jnp.exp(x - m)                                               # (C, T)
    sum_e = jnp.sum(e, axis=0, keepdims=True)                        # (1, T)
    e_t = jnp.sum(jnp.where(onehot, e, 0.0), axis=0, keepdims=True)  # (1, T)
    x_t = jnp.sum(jnp.where(onehot, x, 0.0), axis=0, keepdims=True)  # (1, T)

    nll = jnp.log(sum_e) + m - x_t   # = -log p_t  (>= 0)
    pt = e_t / sum_e                 # p_t, reusing e -- no exp(-nll) transcendental

    # (1 - p_t)**gamma without pow (= exp(log(x)), 2 EUP ops) for small integer gamma.
    omp = jnp.maximum(1.0 - pt, 0.0)
    gi = int(gamma) if float(gamma).is_integer() else None
    if gi is not None and 0 <= gi <= 4:
        w = None
        for _ in range(gi):
            w = omp if w is None else w * omp
        focal = nll if w is None else w * nll
    else:
        focal = jnp.power(omp, gamma) * nll      # (1, T)

    # Note: targets outside [0, C) are not rejected (x_t stays 0, pixel contributes lse);
    # matches use of the reference module without an ignore_index.
    if needs_mask:
        tile_idx = g * tiles_per_group + ti
        in_range = tile_idx < full_tiles         # fully-valid tile (common path)

        @pl.when(in_range)
        def _():
            out_ref[...] += focal

        @pl.when(jnp.logical_not(in_range))
        def _():
            # Ragged last tile or fully out-of-range (clamped) tile: mask stale lanes.
            col = jax.lax.broadcasted_iota(jnp.int32, focal.shape, 1)
            valid = (tile_idx * tile_hw + col) < hw
            out_ref[...] += jnp.where(valid, focal, 0.0)
    else:
        out_ref[...] += focal


def focal_loss_2d(inputs, targets, *, gamma=2.0, tile_hw=None, groups=None):
    """inputs: (N, C, H, W) float logits; targets: (N, H, W) integer class ids.

    Returns the scalar mean focal loss (float32), matching
    FocalLoss2d(gamma, weight=None, reduction='mean').forward(inputs, targets).
    """
    # TODO(synk): optional per-class `weight` and reduction='sum'/'none' variants of
    # nn.NLLLoss are not implemented (the module defaults weight=None, reduction='mean' are).
    N, C, H, W = inputs.shape
    HW = H * W

    # Free reshapes only -- no extra HBM transpose / dtype-cast pass.
    x = inputs.reshape(N, C, HW)
    t = targets
    if not jnp.issubdtype(t.dtype, jnp.integer):
        t = t.astype(jnp.int32)
    t = t.reshape(N, 1, HW)

    if tile_hw is None:
        tile_hw = _choose_tile_hw(HW, C, x.dtype.itemsize)
    num_tiles = pl.cdiv(HW, tile_hw)

    # Guarantee >= 2 parallel chunks when the batch axis can't provide them (v7x megacore).
    if groups is None:
        groups = 2 if (N == 1 and num_tiles >= 2) else 1
    groups = max(1, min(groups, num_tiles))
    tiles_per_group = pl.cdiv(num_tiles, groups)
    total_tiles = groups * tiles_per_group

    needs_mask = (HW % tile_hw != 0) or (total_tiles != num_tiles)
    full_tiles = HW // tile_hw

    kernel = functools.partial(
        _focal_loss_kernel,
        gamma=float(gamma), hw=HW, tile_hw=tile_hw,
        tiles_per_group=tiles_per_group, full_tiles=full_tiles,
        needs_mask=needs_mask,
    )

    def in_map(n, g, ti):
        idx = g * tiles_per_group + ti
        if total_tiles != num_tiles:
            idx = jnp.minimum(idx, num_tiles - 1)  # keep OOB group-padding tiles in bounds
        return (n, 0, idx)

    partials = pl.pallas_call(
        kernel,
        # (N, groups, 1, tile_hw): trailing (1, tile_hw) keeps the out block full-extent
        # on its last two dims regardless of `groups`.
        out_shape=jax.ShapeDtypeStruct((N, groups, 1, tile_hw), jnp.float32),
        grid_spec=pltpu.PrefetchScalarGridSpec(
            num_scalar_prefetch=0,
            grid=(N, groups, tiles_per_group),
            in_specs=[
                # logits: (C, tile_hw) block, channels on sublanes, pixels on lanes
                pl.BlockSpec((None, C, tile_hw), in_map),
                # targets: (1, tile_hw) block, native integer dtype
                pl.BlockSpec((None, 1, tile_hw), in_map),
            ],
            # Per-(batch, group) lane-wide partial sums, VMEM-resident across the
            # reduction (tile) axis.
            out_specs=pl.BlockSpec((None, None, 1, tile_hw),
                                   lambda n, g, ti: (n, g, 0, 0)),
        ),
        compiler_params=pltpu.CompilerParams(
            dimension_semantics=("parallel", "parallel", "arbitrary"),
            vmem_limit_bytes=_vmem_limit_bytes(tile_hw, C, x.dtype.itemsize),
        ),
    )(x, t)

    # Tiny epilogue: one cross-lane reduce + mean division.
    return jnp.sum(partials) / jnp.float32(N * HW)


if __name__ == "__main__":
    key = jax.random.PRNGKey(0)
    k1, k2, k3, k4 = jax.random.split(key, 4)

    def reference(logits, targets, gamma=2.0, eps=1e-10):
        # Pure-JAX mirror of the PyTorch forward.
        p = jax.nn.softmax(logits + eps, axis=1)
        logp = jax.nn.log_softmax(logits + eps, axis=1)
        mod = (1.0 - p) ** gamma * logp                                  # (N, C, H, W)
        idx = targets[:, None, :, :].astype(jnp.int32)
        picked = jnp.take_along_axis(mod, idx, axis=1)[:, 0]
        return -jnp.mean(picked)                                         # NLLLoss, mean

    # Small shapes consistent with the module's segmentation use.
    N, C, H, W = 2, 4, 16, 16
    logits = jax.random.normal(k1, (N, C, H, W), dtype=jnp.float32)
    targets = jax.random.randint(k2, (N, H, W), 0, C, dtype=jnp.int32)
    loss = jax.block_until_ready(focal_loss_2d(logits, targets, gamma=2.0))
    ref = reference(logits, targets)
    assert jnp.allclose(loss, ref, atol=1e-5, rtol=1e-5), (loss, ref)

    # Stress the ragged-tile + tile-group (N=1 -> 2 parallel groups) path.
    N2, C2, H2, W2 = 1, 5, 18, 18
    logits2 = jax.random.normal(k3, (N2, C2, H2, W2), dtype=jnp.float32)
    targets2 = jax.random.randint(k4, (N2, H2, W2), 0, C2, dtype=jnp.int32)
    loss2 = jax.block_until_ready(
        focal_loss_2d(logits2, targets2, gamma=2.0, tile_hw=128))
    ref2 = reference(logits2, targets2)
    assert jnp.allclose(loss2, ref2, atol=1e-5, rtol=1e-5), (loss2, ref2)

    print("KERNEL_OK")
</pallas_src>

<mosaic_0001>
module attributes {stable_mosaic.version = 11 : i64} {
  func.func @_focal_loss_kernel(%arg0: i32, %arg1: i32, %arg2: i32, %arg3: memref<1x4x256xf32, #tpu.memory_space<vmem>>, %arg4: memref<1x1x256xi32, #tpu.memory_space<vmem>>, %arg5: memref<1x1x1x256xf32, #tpu.memory_space<vmem>>) attributes {dimension_semantics = [#tpu.dimension_semantics<parallel>, #tpu.dimension_semantics<parallel>, #tpu.dimension_semantics<arbitrary>], iteration_bounds = array<i64: 2, 1, 1>, scalar_prefetch = 0 : i64, scratch_operands = 0 : i64, tpu.core_type = #tpu.core_type<tc>, window_params = [{transform_indices = @transform_0, window_bounds = array<i64: 1, 4, 256>}, {transform_indices = @transform_1, window_bounds = array<i64: 1, 1, 256>}, {transform_indices = @transform_2, window_bounds = array<i64: 1, 1, 1, 256>}]} {
    %c0_i32 = arith.constant 0 : i32
    %0 = arith.cmpi eq, %arg2, %c0_i32 : i32
    %1 = arith.extui %0 : i1 to i32
    %c0_i32_0 = arith.constant 0 : i32
    %2 = arith.cmpi ne, %1, %c0_i32_0 : i32
    scf.if %2 {
      %cst_21 = arith.constant 0.000000e+00 : f32
      %42 = vector.broadcast %cst_21 : f32 to vector<1x256xf32>
      %c0_22 = arith.constant 0 : index
      %c0_23 = arith.constant 0 : index
      %c0_24 = arith.constant 0 : index
      %c0_25 = arith.constant 0 : index
      %43 = vector.load %arg5[%c0_22, %c0_23, %c0_24, %c0_25] : memref<1x1x1x256xf32, #tpu.memory_space<vmem>>, vector<1x1x1x256xf32>
      %44 = vector.shape_cast %43 : vector<1x1x1x256xf32> to vector<1x256xf32>
      %45 = vector.shape_cast %42 : vector<1x256xf32> to vector<1x1x1x256xf32>
      tpu.vector_store %arg5[%c0_22, %c0_23, %c0_24, %c0_25], %45 {strides = array<i32>} : memref<1x1x1x256xf32, #tpu.memory_space<vmem>>, vector<1x1x1x256xf32>,
    } else {
    }
    %c0 = arith.constant 0 : index
    %c0_1 = arith.constant 0 : index
    %c0_2 = arith.constant 0 : index
    %3 = vector.load %arg3[%c0, %c0_1, %c0_2] : memref<1x4x256xf32, #tpu.memory_space<vmem>>, vector<1x4x256xf32>
    %4 = vector.shape_cast %3 : vector<1x4x256xf32> to vector<4x256xf32>
    %c0_3 = arith.constant 0 : index
    %c0_4 = arith.constant 0 : index
    %c0_5 = arith.constant 0 : index
    %5 = vector.load %arg4[%c0_3, %c0_4, %c0_5] : memref<1x1x256xi32, #tpu.memory_space<vmem>>, vector<1x1x256xi32>
    %6 = vector.shape_cast %5 : vector<1x1x256xi32> to vector<1x256xi32>
    %7 = tpu.iota {dimensions = array<i32: 0>} : vector<4x1xi32>
    %8 = vector.broadcast %7 : vector<4x1xi32> to vector<4x256xi32>
    %9 = vector.broadcast %6 : vector<1x256xi32> to vector<4x256xi32>
    %10 = arith.cmpi eq, %8, %9 : vector<4x256xi32>
    %cst = arith.constant dense<0xFF800000> : vector<256xf32>
    %11 = vector.multi_reduction <maximumf>, %4, %cst [0] : vector<4x256xf32> to vector<256xf32>
    %12 = vector.shape_cast %11 : vector<256xf32> to vector<1x256xf32>
    %13 = vector.broadcast %12 : vector<1x256xf32> to vector<4x256xf32>
    %14 = arith.subf %4, %13 : vector<4x256xf32>
    %15 = math.exp %14 : vector<4x256xf32>
    %cst_6 = arith.constant dense<0.000000e+00> : vector<256xf32>
    %16 = vector.multi_reduction <add>, %15, %cst_6 [0] : vector<4x256xf32> to vector<256xf32>
    %17 = vector.shape_cast %16 : vector<256xf32> to vector<1x256xf32>
    %cst_7 = arith.constant 0.000000e+00 : f32
    %18 = vector.broadcast %cst_7 : f32 to vector<4x256xf32>
    %19 = arith.select %10, %15, %18 : vector<4x256xi1>, vector<4x256xf32>
    %cst_8 = arith.constant dense<0.000000e+00> : vector<256xf32>
    %20 = vector.multi_reduction <add>, %19, %cst_8 [0] : vector<4x256xf32> to vector<256xf32>
    %21 = vector.shape_cast %20 : vector<256xf32> to vector<1x256xf32>
    %cst_9 = arith.constant 0.000000e+00 : f32
    %22 = vector.broadcast %cst_9 : f32 to vector<4x256xf32>
    %23 = arith.select %10, %4, %22 : vector<4x256xi1>, vector<4x256xf32>
    %cst_10 = arith.constant dense<0.000000e+00> : vector<256xf32>
    %24 = vector.multi_reduction <add>, %23, %cst_10 [0] : vector<4x256xf32> to vector<256xf32>
    %25 = vector.shape_cast %24 : vector<256xf32> to vector<1x256xf32>
    %26 = math.log %17 : vector<1x256xf32>
    %27 = arith.addf %26, %12 : vector<1x256xf32>
    %28 = arith.subf %27, %25 : vector<1x256xf32>
    %29 = arith.divf %21, %17 : vector<1x256xf32>
    %cst_11 = arith.constant 1.000000e+00 : f32
    %30 = vector.broadcast %cst_11 : f32 to vector<1x256xf32>
    %31 = arith.subf %30, %29 : vector<1x256xf32>
    %cst_12 = arith.constant 0.000000e+00 : f32
    %32 = vector.broadcast %cst_12 : f32 to vector<1x256xf32>
    %33 = arith.maximumf %31, %32 : vector<1x256xf32>
    %34 = arith.mulf %33, %33 : vector<1x256xf32>
    %35 = arith.mulf %34, %28 : vector<1x256xf32>
    %c0_13 = arith.constant 0 : index
    %c0_14 = arith.constant 0 : index
    %c0_15 = arith.constant 0 : index
    %c0_16 = arith.constant 0 : index
    %36 = vector.load %arg5[%c0_13, %c0_14, %c0_15, %c0_16] : memref<1x1x1x256xf32, #tpu.memory_space<vmem>>, vector<1x1x1x256xf32>
    %37 = vector.shape_cast %36 : vector<1x1x1x256xf32> to vector<1x256xf32>
    %38 = arith.addf %37, %35 : vector<1x256xf32>
    %c0_17 = arith.constant 0 : index
    %c0_18 = arith.constant 0 : index
    %c0_19 = arith.constant 0 : index
    %c0_20 = arith.constant 0 : index
    %39 = vector.load %arg5[%c0_17, %c0_18, %c0_19, %c0_20] : memref<1x1x1x256xf32, #tpu.memory_space<vmem>>, vector<1x1x1x256xf32>
    %40 = vector.shape_cast %39 : vector<1x1x1x256xf32> to vector<1x256xf32>
    %41 = vector.shape_cast %38 : vector<1x256xf32> to vector<1x1x1x256xf32>
    tpu.vector_store %arg5[%c0_17, %c0_18, %c0_19, %c0_20], %41 {strides = array<i32>} : memref<1x1x1x256xf32, #tpu.memory_space<vmem>>, vector<1x1x1x256xf32>,
    return
  }
  func.func @transform_0(%arg0: i32, %arg1: i32, %arg2: i32) -> (i32, i32, i32) {
    %c1_i32 = arith.constant 1 : i32
    %0 = arith.muli %arg1, %c1_i32 : i32
    %1 = arith.addi %0, %arg2 : i32
    %c0_i32 = arith.constant 0 : i32
    %c0_i32_0 = arith.constant 0 : i32
    return %arg0, %c0_i32, %1 : i32, i32, i32
  }
  func.func @transform_1(%arg0: i32, %arg1: i32, %arg2: i32) -> (i32, i32, i32) {
    %c1_i32 = arith.constant 1 : i32
    %0 = arith.muli %arg1, %c1_i32 : i32
    %1 = arith.addi %0, %arg2 : i32
    %c0_i32 = arith.constant 0 : i32
    %c0_i32_0 = arith.constant 0 : i32
    return %arg0, %c0_i32, %1 : i32, i32, i32
  }
  func.func @transform_2(%arg0: i32, %arg1: i32, %arg2: i32) -> (i32, i32, i32, i32) {
    %c0_i32 = arith.constant 0 : i32
    %c0_i32_0 = arith.constant 0 : i32
    %c0_i32_1 = arith.constant 0 : i32
    return %arg0, %arg1, %c0_i32, %c0_i32_0 : i32, i32, i32, i32
  }
}

</mosaic_0001>

<bundles_post_ra>
// kernel: tpu_custom_call.1
= control target key start
LH: loop header
LB: loop body
LE: loop exit
PB: predicated region body
PF: predicated region fallthrough
CT: control target
= control target key end

     0   :  { %7 = vsyncpa [#allocation3], 0  ;;  %s979_s0 = inlined_call_operand.hbm [shape: f32[2,4,256], index: 0, kind: input, shape index: {}]   ;;  %s980_s1 = inlined_call_operand.hbm [shape: s32[2,1,256], index: 1, kind: input, shape index: {}]   ;;  %s981_s2 = inlined_call_operand.hbm [shape: f32[2,1,1,256], index: 2, kind: output, shape index: {}]  }
   0x1   :  { %9 = vsyncpa [#allocation3 + $0x1], 0 }
   0x2   :  { %10 = vsyncpa [#allocation6], 0 }
   0x3   :  { %12 = vsyncpa [#allocation6 + $0x1], 0 }
   0x4   :  { %13 = vsyncpa [#allocation4], 0 }
   0x5   :  { %15 = vsyncpa [#allocation4 + $0x1], 0  ;;  %s775_s9 = smov 0   ;;  %s777_s10 = smov 0  }
   0x6   :  { %s779_s11 = smov 0   ;;  %s781_s12 = smov 0  }
   0x7   :  { %s783_s13 = smov 0   ;;  %s785_s14 = smov 0  }
   0x8 LB: > { %s511_s15 = sadd.s32 4294967295, %s753_s14   ;;  %s512_s16 = sadd.s32 4294967294, %s753_s14   ;;  %s753_s14 = sphi %s785_s14, %s21_s14   ;;  %s749_s13 = sphi %s783_s13, %s995_s13   ;;  %s745_s12 = sphi %s781_s12, %s994_s12   ;;  %s741_s11 = sphi %s779_s11, %s993_s11   ;;  %s737_s10 = sphi %s777_s10, %s992_s10   ;;  %s733_s9 = sphi %s775_s9, %s991_s9  }
   0x9   : > { %s40_s17 = sadd.s32 1, %s749_s13  ;;  %s51_s18 = sadd.s32 1, %s741_s11 }
   0xa   : > { %p42_p0 = scmp.ge.s32.totalorder %s40_s17, 2  ;;  %p58_p1 = scmp.ne.s32.totalorder %s741_s11, %s737_s10 }
   0xb   : > { %p59_p2 = scmp.eq.s32.totalorder %s753_s14, 0  ;;  %p64_p3 = scmp.ne.s32.totalorder %s737_s10, %s733_s9 }
   0xc   : > { %s997_s17 = smov (%p42_p0, %s40_s17), 0  ;;  %p65_p5 = scmp.eq.s32.totalorder %s511_s15, 0 }
   0xd   : > { %p816_p4 = por %p59_p2, %p58_p1  ;;  %s46_s20 = ssub.s32 %s749_s13, %s997_s17 }
   0xe   : > { %p120_p6 = scmp.eq.s32.totalorder %s511_s15, 1  ;;  %p49_p7 = scmp.eq.s32.totalorder %s46_s20, 0 }
   0xf   : > { %p822_p8 = por %p65_p5, %p64_p3  ;;  %p126_p10 = scmp.eq.s32.totalorder %s512_s16, 1 }
  0x10   : > { %p826_p9 = por %p120_p6, %p58_p1  ;;  %p550_p13 = scmp.lt.s32.totalorder %s753_s14, 2 }
  0x11   : > { %s831_s23 = scalar_select %p49_p7, %s741_s11, %s51_s18  }
  0x12   : > { %p833_p11 = por %p126_p10, %p64_p3  ;;  %s840_s25 = sand.u32 1, %s741_s11  }
  0x13   : > { %s515_s26 = sshll.u32 %s840_s25, 3  ;;  %s530_s27 = sshll.u32 %s749_s13, 7 }
  0x14   : > { %s159_s30 = scalar_lea.hbm %s979_s0, %s530_s27  ;;  %s150_s3 = scalar_lea.vmem [#allocation2], %s515_s26 }
  0x15   : > { %s161_s4 = sshll.u32 %s150_s3, 4  ;;  %p849_p0 = pnand %p550_p13, %p816_p4  ;;  %s162_s4 = int_to_ptr.vmem [resolvable:$true] %s161_s4 }
  0x16   : > { %p521_p1 = scmp.ge.s32.totalorder %s753_s14, 1  ;;  %p188_p2 = scmp.lt.s32.totalorder %s753_s14, 3 }
  0x17   : > { %s147_s6 = scalar_lea.sflag [#allocation3], %s840_s25  ;;  %p615_p3 = pneg %p849_p0 }
  0x18   : > { %s626_s7 = scalar_lea.vmem %s162_s4, 128  ;;  %s755_s8 = smov [#allocation2]  }
  0x19   : > { %p627_p5 = scmp.ne.s32.totalorder %s162_s4, %s626_s7  ;;  %s631_s15 = sshll.u32 %s755_s8, 4  ;;  %s632_s15 = int_to_ptr.vmem [resolvable:$false] %s631_s15 }
  0x1a   : > { %s633_s16 = scalar_lea.vmem %s632_s15, 256  ;;  %p634_p4 = scmp.lt.s32.totalorder %s162_s4, %s632_s15 }
  0x1b   : > { %p629_p6 = pnand %p627_p5, %p615_p3  ;;  %p635_p10 = scmp.lt.s32.totalorder %s633_s16, %s626_s7 }
  0x1d   : > { %p630_p7 = pneg %p629_p6  ;;  %p636_p13 = por %p635_p10, %p634_p4 }
  0x1f   : > { %p637_p12 = pnand %p636_p13, %p630_p7 }
  0x21   : > { %640 = shalt.err (!%p637_p12)
}
  0x22   : > { %542 = dma.hbm_to_vmem [thread:$0]  (!%p849_p0), %s159_s30, 128, %s162_s4, %s147_s6  }
  0x23   : > { %p867_p5 = pnand %p521_p1, %p188_p2  ;;  %s518_s19 = sshll.u32 %s840_s25, 1 }
  0x24   : > { %s531_s20 = sshll.u32 %s749_s13, 5  ;;  %s172_s29 = scalar_lea.vmem [#allocation5], %s518_s19 }
  0x25   : > { %s181_s28 = scalar_lea.hbm %s980_s1, %s531_s20  ;;  %s183_s3 = sshll.u32 %s172_s29, 4  ;;  %s184_s3 = int_to_ptr.vmem [resolvable:$true] %s183_s3 }
  0x26   : > { %s169_s7 = scalar_lea.sflag [#allocation6], %s840_s25  ;;  %s654_s8 = scalar_lea.vmem %s184_s3, 32 }
  0x27   : > { %p655_p12 = scmp.ne.s32.totalorder %s184_s3, %s654_s8  ;;  %s756_s30 = smov [#allocation5]  }
  0x28   : > { %s659_s4 = sshll.u32 %s756_s30, 4  ;;  %s660_s4 = int_to_ptr.vmem [resolvable:$false] %s659_s4 }
  0x29   : > { %p657_p6 = pnand %p655_p12, %p615_p3  ;;  %s661_s6 = scalar_lea.vmem %s660_s4, 64 }
  0x2a   : > { %p662_p1 = scmp.lt.s32.totalorder %s184_s3, %s660_s4  ;;  %p663_p2 = scmp.lt.s32.totalorder %s661_s6, %s654_s8 }
  0x2b   : > { %p658_p7 = pneg %p657_p6 }
  0x2c   : > { %p664_p4 = por %p663_p2, %p662_p1 }
  0x2e   : > { %p665_p10 = pnand %p664_p4, %p658_p7 }
  0x30   : > { %668 = shalt.err (!%p665_p10)
}
  0x31   : > { %545 = dma.hbm_to_vmem [thread:$0]  (!%p849_p0), %s181_s28, 32, %s184_s3, %s169_s7  }
  0x32   : > { %192 = sbr.rel (%p867_p5) target bundleno = 156 (0x9c), region = 28  ;;  %s885_s25 = sand.u32 (!%p867_p5), 1, %s737_s10  }
  0x33   : > { %s522_s15 = sshll.u32 (!%p867_p5), %s885_s25, 3  ;;  %s195_s16 = scalar_lea.sflag (!%p867_p5), [#allocation3], %s885_s25 }
  0x34   : > { %s198_s19 = scalar_lea.vmem (!%p867_p5), [#allocation2], %s522_s15 }
  0x37   : > { %720 = dma.done.wait (%p822_p8), %s195_s16, 128  }
  0x38   : > { %722 = vsyncadd (%p822_p8), %s195_s16, 4294967168  ;;  %s523_s5 = sshll.u32 %s885_s25, 1  ;;  %s204_s18 = scalar_lea.sflag [#allocation6], %s885_s25 }
  0x39   : > { %s895_s20 = scalar_lea.vmem [#allocation5], %s523_s5 }
  0x3a   : > { %724 = dma.done.wait (%p822_p8), %s204_s18, 32  }
  0x3b   : > { %726 = vsyncadd (%p822_p8), %s204_s18, 4294967264  ;;  %v241_v0 = vlaneseq  ;;  %s905_s26 = scalar_lea.vmem [#allocation7], %s523_s5  ;;  %v757_v2 = vmov 0.0   ;;  %vm263_vm1 = vcmask 1043456   ;;  %v246_v3 = vld [vmem:[%s198_s19] sm:$0xff]  ;;  %s532_s21 = sshll.u32 %s745_s12, 5 }
  0x3c   : > { %v261_v4 = vcombine.high %v246_v3, %v246_v3  ;;  %v264_v5 = vsel %vm263_vm1, %v246_v3, -inf  ;;  %v247_v24 = vld [vmem:[%s895_s20] sm:$0x3]  ;;  %s396_s27 = sshll.u32 %s905_s26, 4  ;;  %s394_s3 = scalar_lea.hbm %s981_s2, %s532_s21  ;;  %s397_s27 = int_to_ptr.vmem [resolvable:$true] %s396_s27 }
  0x3d   : > { %vm901_vm0 = vcmp.lt.s32.totalorder %v241_v0, 256  ;;  %v265_v6 = vrot.slane %v264_v5, 4  ;;  %v918_v22 = vshrl.u32 %v241_v0, 7  ;;  %s380_s7 = scalar_lea.sflag [#allocation4], %s885_s25  ;;  %s669_s8 = scalar_lea.vmem %s397_s27, 32 }
  0x3e   : > { %245 = vst.msk [vmem:[%s905_s26] sm:$0x3] %vm901_vm0, %v757_v2  ;;  %v271_v7 = vsel %vm263_vm1, %v261_v4, -inf  ;;  %p670_p8 = scmp.ne.s32.totalorder %s397_s27, %s669_s8  ;;  %s759_s30 = smov [#allocation7]  }
  0x3f   : > { %v266_v8 = vmax.f32 %v264_v5, %v265_v6  ;;  %v272_v9 = vrot.slane %v271_v7, 4  ;;  %v252_v23 = vsub.s32 0, %v918_v22  ;;  %v256_v25 = vsub.s32 1, %v918_v22  ;;  %s673_s4 = sshll.u32 %s759_s30, 4  ;;  %s674_s4 = int_to_ptr.vmem [resolvable:$false] %s673_s4 }
  0x40   : > { %p671_p0 = pnand %p670_p8, %p826_p9  ;;  %s675_s12 = scalar_lea.vmem %s674_s4, 64 }
  0x41   : > { %v267_v10 = vrot.slane %v266_v8, 2  ;;  %v273_v11 = vmax.f32 %v271_v7, %v272_v9  ;;  %v253_v26 = vrot.slane %v247_v24, %v252_v23  ;;  %v257_v27 = vrot.slane %v247_v24, %v256_v25  ;;  %p676_p13 = scmp.lt.s32.totalorder %s397_s27, %s674_s4  ;;  %p677_p5 = scmp.lt.s32.totalorder %s675_s12, %s669_s8 }
  0x42   : > { %p672_p3 = pneg %p671_p0 }
  0x43   : > { %v268_v12 = vmax.f32 %v266_v8, %v267_v10  ;;  %v274_v13 = vrot.slane %v273_v11, 2  ;;  %vm258_vm2 = vcmp.eq.s32.totalorder %v918_v22, %v253_v26  ;;  %vm259_vm3 = vcmp.eq.s32.totalorder %v918_v22, %v257_v27  ;;  %p678_p12 = por %p677_p5, %p676_p13 }
  0x44   : > { %v318_v36 = vsel %vm258_vm2, %v246_v3, 0.0  ;;  %v319_v41 = vsel %vm259_vm3, %v261_v4, 0.0  ;;  %v758_v26 = vmov 1966171168  }
  0x45   : > { %v269_v14 = vrot.slane %v268_v12, 1  ;;  %v275_v15 = vmax.f32 %v273_v11, %v274_v13  ;;  %v320_v44 = vsel %vm263_vm1, %v318_v36, 0.0  ;;  %v327_v48 = vsel %vm263_vm1, %v319_v41, 0.0  ;;  %v354_v41 = vld [vmem:[%s905_s26] sm:$0x3]  ;;  %p679_p6 = pnand %p678_p12, %p672_p3 }
  0x46   : > { %v321_v50 = vrot.slane %v320_v44, 4  ;;  %v328_v54 = vrot.slane %v327_v48, 4  ;;  %v359_v27 = vunpack.c.l.s4 %v758_v26 }
  0x47   : > { %v912_v16 = vmax.f32 %v268_v12, %v269_v14  ;;  %v276_v17 = vrot.slane %v275_v15, 1 }
  0x48   : > { %v322_v58 = vadd.f32 %v321_v50, %v320_v44  ;;  %v329_v61 = vadd.f32 %v328_v54, %v327_v48 }
  0x49   : > { %v914_v18 = vmax.f32 %v275_v15, %v276_v17 }
  0x4a   : > { %v323_v63 = vrot.slane %v322_v58, 2  ;;  %v330_v2 = vrot.slane %v329_v61, 2 }
  0x4b   : > { %v280_v19 = vcombine.low %v912_v16, %v914_v18 }
  0x4c   : > { %v324_v4 = vadd.f32 %v323_v63, %v322_v58  ;;  %v331_v6 = vadd.f32 %v330_v2, %v329_v61 }
  0x4d   : > { %v282_v20 = vsub.f32 %v246_v3, %v280_v19 }
  0x4e   : > { %v325_v8 = vrot.slane %v324_v4, 1  ;;  %v332_v11 = vrot.slane %v331_v6, 1 }
  0x4f   : > { %v283_v21 = vmul.f32 1.442695, %v282_v20 }
  0x50   : > { %v326_v15 = vadd.f32 %v325_v8, %v324_v4  ;;  %v333_v23 = vadd.f32 %v332_v11, %v331_v6 }
  0x51   : > { %603 = vpow2.f32 %v283_v21 }
  0x5e   : > { %v604_v28 = vpop.eup %603 }
  0x5f   : > { %v286_v29 = vcombine.high %v604_v28, %v604_v28  ;;  %v288_v30 = vsel %vm263_vm1, %v604_v28, 0.0  ;;  %v302_v31 = vsel %vm258_vm2, %v604_v28, 0.0 }
  0x60   : > { %v289_v32 = vrot.slane %v288_v30, 4  ;;  %v304_v33 = vsel %vm263_vm1, %v302_v31, 0.0 }
  0x61   : > { %v295_v34 = vsel %vm263_vm1, %v286_v29, 0.0  ;;  %v303_v35 = vsel %vm259_vm3, %v286_v29, 0.0  ;;  %v305_v40 = vrot.slane %v304_v33, 4 }
  0x62   : > { %v290_v37 = vadd.f32 %v289_v32, %v288_v30  ;;  %v296_v38 = vrot.slane %v295_v34, 4  ;;  %v311_v39 = vsel %vm263_vm1, %v303_v35, 0.0  ;;  %v360_v35 = vunpack.c.0.s8 %v359_v27 }
  0x63   : > { %v312_v45 = vrot.slane %v311_v39, 4  ;;  %v306_v49 = vadd.f32 %v305_v40, %v304_v33 }
  0x64   : > { %v291_v42 = vrot.slane %v290_v37, 2  ;;  %v297_v43 = vadd.f32 %v296_v38, %v295_v34  ;;  %v363_v38 = vsub.s32 %v360_v35, %v918_v22 }
  0x65   : > { %v313_v53 = vadd.f32 %v312_v45, %v311_v39  ;;  %v307_v57 = vrot.slane %v306_v49, 2 }
  0x66   : > { %v292_v46 = vadd.f32 %v291_v42, %v290_v37  ;;  %v298_v47 = vrot.slane %v297_v43, 2 }
  0x67   : > { %v314_v60 = vrot.slane %v313_v53, 2  ;;  %v308_v62 = vadd.f32 %v307_v57, %v306_v49 }
  0x68   : > { %v293_v51 = vrot.slane %v292_v46, 1  ;;  %v299_v52 = vadd.f32 %v298_v47, %v297_v43 }
  0x69   : > { %v315_v0 = vadd.f32 %v314_v60, %v313_v53  ;;  %v309_v3 = vrot.slane %v308_v62, 1 }
  0x6a   : > { %v294_v55 = vadd.f32 %v293_v51, %v292_v46  ;;  %v300_v56 = vrot.slane %v299_v52, 1 }
  0x6b   : > { %v316_v5 = vrot.slane %v315_v0, 1  ;;  %v310_v7 = vadd.f32 %v309_v3, %v308_v62 }
  0x6c   : > { %v301_v59 = vadd.f32 %v300_v56, %v299_v52  ;;  %605 = vlog2.f32 %v294_v55 }
  0x6d   : > { %607 = vrcp.f32 %v294_v55  ;;  %v317_v10 = vadd.f32 %v316_v5, %v315_v0 }
  0x6e   : > { %609 = vlog2.f32 %v301_v59 }
  0x6f   : > { %611 = vrcp.f32 %v301_v59 }
  0x79   : > { %v606_v9 = vpop.eup %605 }
  0x7a   : > { %v608_v12 = vpop.eup %607  ;;  %v335_v13 = vmul.f32 0.6931472, %v606_v9 }
  0x7b   : > { %v610_v14 = vpop.eup %609  ;;  %v343_v17 = vmul.f32 %v608_v12, %v310_v7 }
  0x7c   : > { %v612_v19 = vpop.eup %611  ;;  %v337_v20 = vmul.f32 0.6931472, %v610_v14  ;;  %v338_v21 = vadd.f32 %v335_v13, %v912_v16 }
  0x7d   : > { %v345_v24 = vmul.f32 %v612_v19, %v317_v10  ;;  %v346_v25 = vsub.f32 1.0, %v343_v17 }
  0x7e   : > { %v339_v28 = vadd.f32 %v337_v20, %v914_v18  ;;  %v340_v29 = vsub.f32 %v338_v21, %v326_v15 }
  0x7f   : > { %v347_v30 = vsub.f32 1.0, %v345_v24  ;;  %v348_v31 = vmax.f32 %v346_v25, 0.0 }
  0x80   : > { %v341_v32 = vsub.f32 %v339_v28, %v333_v23 }
  0x81   : > { %v349_v33 = vmax.f32 %v347_v30, 0.0  ;;  %v350_v34 = vmul.f32 %v348_v31, %v348_v31 }
  0x83   : > { %v351_v16 = vmul.f32 %v349_v33, %v349_v33  ;;  %v352_v36 = vmul.f32 %v350_v34, %v340_v29 }
  0x85   : > { %v353_v37 = vmul.f32 %v351_v16, %v341_v32 }
  0x87   : > { %v357_v39 = vcombine.low %v352_v36, %v353_v37 }
  0x89   : > { %v364_v40 = vrot.slane %v357_v39, %v363_v38 }
  0x8b   : > { %v371_v18 = vrot.slane %v364_v40, %v363_v38 }
  0x8d   : > { %v373_v42 = vadd.f32 %v371_v18, %v354_v41 }
  0x8f   : > { %378 = vst.msk [vmem:[%s905_s26] sm:$0x3] %vm901_vm0, %v373_v42 }
  0x90   : > { %682 = shalt.err (!%p679_p6)
}
  0x91   : > { %s683_s6 = scalar_lea.hbm %s394_s3, 32  ;;  %s687_s16 = scalar_lea.hbm %s981_s2, 64 }
  0x92   : > { %p684_p7 = scmp.ne.s32.totalorder %s394_s3, %s683_s6  ;;  %p688_p4 = scmp.lt.s32.totalorder %s394_s3, %s981_s2 }
  0x93   : > { %p689_p10 = scmp.lt.s32.totalorder %s687_s16, %s683_s6 }
  0x94   : > { %p685_p1 = pnand %p684_p7, %p826_p9 }
  0x95   : > { %p690_p8 = por %p689_p10, %p688_p4 }
  0x96   : > { %p686_p2 = pneg %p685_p1 }
  0x98   : > { %p691_p0 = pnand %p690_p8, %p686_p2 }
  0x9a   : > { %694 = shalt.err (!%p691_p0)
}
  0x9b   : > { %537 = dma.vmem_to_hbm [thread:$0]  (%p826_p9), %s397_s27, 32, %s394_s3, %s380_s7  }
  0x9c PF: > { %s408_s18 = sand.u32 1, %s733_s9   ;;  %p990_p3 = scmp.ge.s32.totalorder %s753_s14, 2 }
  0x9d   : > { %s409_s20 = scalar_lea.sflag [#allocation4], %s408_s18 }
  0x9e   : > { %p547_p13 = pnand %p990_p3, %p833_p11 }
  0xa0   : > { %p548_p5 = pneg %p547_p13 }
  0xa2   : > { %728 = dma.done.wait (%p548_p5), %s409_s20, 32  }
  0xa3   : > { %730 = vsyncadd (%p548_p5), %s409_s20, 4294967264  ;;  %s21_s14 = sadd.s32 1, %s753_s14   ;;  %s991_s9 = smov %s737_s10 }
  0xa4   : > { %p18_p12 = scmp.ge.s32.totalorder %s21_s14, 4   ;;  %s992_s10 = smov %s741_s11 }
  0xa5   : > { %s993_s11 = smov %s831_s23  ;;  %s994_s12 = smov %s749_s13 }
  0xa6   : > { %s995_s13 = smov %s997_s17  ;;  %20 = sbr.rel (!%p18_p12) target bundleno = 8 (0x8), region = 90 }
  0xab   :  { %414 = vsyncpa [#allocation3], 1 }
  0xac   :  { %416 = vsyncpa [#allocation3 + $0x1], 1 }
  0xad   :  { %417 = vsyncpa [#allocation6], 1 }
  0xae   :  { %419 = vsyncpa [#allocation6 + $0x1], 1 }
  0xaf   :  { %420 = vsyncpa [#allocation4], 1 }
  0xb0   :  { %422 = vsyncpa [#allocation4 + $0x1], 1 }

</bundles_post_ra>
